<compile_context>
chip_gen: v6e
topology: v6e:2x2x1
jax: 0.10.0
libtpu: 0.0.40
codegen_flags: <defaults>
</compile_context>

<pallas_src>
import functools
import math

import numpy as np
import jax
import jax.numpy as jnp
from jax.experimental import pallas as pl
from jax.experimental.pallas import tpu as pltpu


# ------------------------------ Pallas kernel -------------------------------

def _attention_ring_kernel(qt_ref, v_ref, gsum_ref, w1t_ref, wv_ref, bv_ref,
                           ctx_ref, score_ref, *, batch_tile, points, cv):
    # ---- fused (W1 | b1) -> tanh -> <wv, .> + bv -> sigmoid ----------------
    # All batches of this group are stacked along the lane axis, so this one
    # bf16 matmul is the MXU-filling workhorse.
    h = jnp.dot(w1t_ref[...], qt_ref[...],
                preferred_element_type=jnp.float32)               # (H, BT*S) f32
    h = jnp.tanh(h)
    # VPU multiply + cross-sublane reduce instead of an M=1 MXU matmul.
    z = jnp.sum(h * wv_ref[...], axis=0, keepdims=True) + bv_ref[0]  # (1, BT*S)
    s = jax.nn.sigmoid(z)                                         # f32 scores
    score_ref[...] = s.astype(score_ref.dtype)                    # lane-dense store

    # ---- ring aggregation: one bf16 MXU matmul per batch gives both the
    # numerator (columns :Cv) and the denominator (appended ones column) -----
    gsum = gsum_ref[...]                                          # (N, S) bf16
    for b in range(batch_tile):                                   # static unroll
        s_b = s[:, b * points:(b + 1) * points]                   # (1, S) f32
        a_b = (gsum * s_b).astype(jnp.bfloat16)                   # (N, S), sublane bcast
        nd = jnp.dot(a_b, v_ref[b],
                     preferred_element_type=jnp.float32)          # (N, Cv+1) f32
        num = nd[:, :cv]                                          # (N, Cv)
        den = nd[:, cv:cv + 1]                                    # (N, 1)
        ctx_ref[b] = (num * pl.reciprocal(den, approx=False)).astype(ctx_ref.dtype)


# -------------------------------- wrapper -----------------------------------

def attention_ring_pallas(params, query, values, gsum_bf16, neigh_idx,
                          *, batch_tile=None):
    """AttentionRing.forward.  query: (B,S,C), values: (B,S,Cv)."""
    B, S, C = query.shape
    Cv = values.shape[-1]
    N = gsum_bf16.shape[0]
    H = params["w1"].shape[1]

    bt = batch_tile if batch_tile is not None else (2 if B % 2 == 0 else 1)
    assert B % bt == 0, "batch must be divisible by the batch tile"
    groups = B // bt

    f32, bf16 = jnp.float32, jnp.bfloat16

    # Lane-dense, MXU-filling layouts (layout plumbing done once by XLA).
    qt = jnp.transpose(query, (2, 0, 1)).reshape(C, B * S)               # (C, B*S)
    qt_aug = jnp.concatenate([qt, jnp.ones((1, B * S), qt.dtype)],
                             axis=0).astype(bf16)                        # (C+1, B*S)
    w1t_aug = jnp.concatenate([params["w1"].T, params["b1"].reshape(H, 1)],
                              axis=1).astype(bf16)                       # (H, C+1)
    wv_col = params["wv"].reshape(H, 1).astype(f32)                      # (H, 1)
    bv = params["bv"].reshape(1).astype(f32)                             # (1,) SMEM
    v_aug = jnp.concatenate([values, jnp.ones((B, S, 1), values.dtype)],
                            axis=-1).astype(bf16)                        # (B, S, Cv+1)

    # Explicit VMEM cap: live blocks at these shapes are ~1 MiB; 32 MiB is
    # within every generation's budget (v7x physical VMEM is 64 MiB).
    vmem_cap = 32 * 1024 * 1024

    ctx, score_flat = pl.pallas_call(
        functools.partial(_attention_ring_kernel,
                          batch_tile=bt, points=S, cv=Cv),
        out_shape=(jax.ShapeDtypeStruct((B, N, Cv), jnp.float32),
                   jax.ShapeDtypeStruct((1, B * S), jnp.float32)),
        grid=(groups,),
        in_specs=[
            pl.BlockSpec((C + 1, bt * S), lambda g: (0, g)),     # [q^T ; 1]  bf16
            pl.BlockSpec((bt, S, Cv + 1), lambda g: (g, 0, 0)),  # [v | 1]    bf16
            pl.BlockSpec((N, S), lambda g: (0, 0)),              # gsum (resident)
            pl.BlockSpec((H, C + 1), lambda g: (0, 0)),          # [W1^T | b1]
            pl.BlockSpec((H, 1), lambda g: (0, 0)),              # wv column
            pl.BlockSpec(memory_space=pltpu.MemorySpace.SMEM),   # bv scalar
        ],
        out_specs=(pl.BlockSpec((bt, N, Cv), lambda g: (g, 0, 0)),
                   pl.BlockSpec((1, bt * S), lambda g: (0, g))),
        compiler_params=pltpu.CompilerParams(
            dimension_semantics=("parallel",),   # batch groups across v7x TCs
            vmem_limit_bytes=vmem_cap),
    )(qt_aug, v_aug, gsum_bf16, w1t_aug, wv_col, bv)

    # Per-neighbour scores: exact f32 per-point scores gathered by plain XLA.
    score = score_flat.reshape(B, S)[:, neigh_idx][..., None]            # (B,N,K,1)
    return ctx, score


# ------------------------- static ring preprocessing -------------------------

def build_ring_tables(neigh_orders, num_points):
    """Replicates AttentionRing's 6->7 neighbour padding and builds the static
    multiplicity (scatter) matrix used by the kernel plus the (N, K) index
    table used for the wrapper-side score gather."""
    for data in neigh_orders:                 # same in-place padding as torch
        if len(data) == 6:
            repeat_neighbor = data[0]
            data.append(repeat_neighbor)
    idx = np.asarray(neigh_orders, dtype=np.int32)                # (N, K)
    N, K = idx.shape
    rows = np.repeat(np.arange(N), K)
    cols = idx.reshape(-1)
    gsum = np.zeros((N, num_points), np.float32)
    np.add.at(gsum, (rows, cols), 1.0)                            # multiplicity
    # Counts are small integers -> exact in bf16; cast offline so the resident
    # VMEM block is half-width.
    return jnp.asarray(idx), jnp.asarray(gsum, dtype=jnp.bfloat16)


# ------------------------------- parameters ----------------------------------

def init_params(key, in_units, out_units):
    k1, k2, k3, k4 = jax.random.split(key, 4)
    lim1 = 1.0 / math.sqrt(in_units)
    lim2 = 1.0 / math.sqrt(out_units)
    return {
        "w1": jax.random.uniform(k1, (in_units, out_units), jnp.float32, -lim1, lim1),
        "b1": jax.random.uniform(k2, (out_units,), jnp.float32, -lim1, lim1),
        "wv": jax.random.uniform(k3, (out_units, 1), jnp.float32, -lim2, lim2),
        "bv": jax.random.uniform(k4, (1,), jnp.float32, -lim2, lim2),
    }


# ---------------------------- pure-JAX reference -----------------------------

def attention_ring_reference(params, query, values, neigh_idx):
    q_g = query[:, neigh_idx]                                    # (B, N, K, C)
    v_g = values[:, neigh_idx]                                   # (B, N, K, Cv)
    h = jnp.tanh(jnp.einsum("bnkc,ch->bnkh", q_g, params["w1"]) + params["b1"])
    score = jax.nn.sigmoid(jnp.einsum("bnkh,ho->bnko", h, params["wv"])
                           + params["bv"])                       # (B, N, K, 1)
    attn = score / jnp.sum(score, axis=2, keepdims=True)
    ctx = jnp.sum(attn * v_g, axis=2)                            # (B, N, Cv)
    return ctx, score


# ----------------------------------- main ------------------------------------

if __name__ == "__main__":
    B, S = 2, 128                  # batch, number of ring vertices
    in_units, out_units = 128, 64  # SelfAttention(in_units, out_units)

    key = jax.random.PRNGKey(0)
    kq, kv, kp = jax.random.split(key, 3)
    query = jax.random.normal(kq, (B, S, in_units), jnp.float32)
    values = jax.random.normal(kv, (B, S, in_units), jnp.float32)
    params = init_params(kp, in_units, out_units)

    # Ring connectivity: alternate 6- and 7-neighbour rings so the module's
    # 6->7 repeat-first-neighbour padding path is exercised.
    neigh_orders = []
    for n in range(S):
        width = 6 if n % 2 == 0 else 7
        neigh_orders.append([(n + d) % S for d in range(width)])
    neigh_idx, gsum = build_ring_tables(neigh_orders, S)
    K = neigh_idx.shape[1]
    assert K == 7

    fwd = jax.jit(attention_ring_pallas)
    ctx, score = fwd(params, query, values, gsum, neigh_idx)
    jax.block_until_ready((ctx, score))

    # correctness check against the pure-JAX reference (loose tol: bf16 MXU
    # operands in the kernel).
    ctx_ref, score_ref = attention_ring_reference(params, query, values, neigh_idx)
    assert ctx.shape == (B, S, in_units)
    assert score.shape == (B, S, K, 1)
    assert bool(jnp.allclose(ctx, ctx_ref, atol=5e-2, rtol=5e-2))
    assert bool(jnp.allclose(score, score_ref, atol=5e-2, rtol=5e-2))
    print("KERNEL_OK")
</pallas_src>

<mosaic_0001>
module attributes {stable_mosaic.version = 11 : i64} {
  func.func @_attention_ring_kernel(%arg0: i32, %arg1: memref<129x256xbf16, #tpu.memory_space<vmem>>, %arg2: memref<2x128x129xbf16, #tpu.memory_space<vmem>>, %arg3: memref<128x128xbf16, #tpu.memory_space<vmem>>, %arg4: memref<64x129xbf16, #tpu.memory_space<vmem>>, %arg5: memref<64x1xf32, #tpu.memory_space<vmem>>, %arg6: memref<1xf32, #tpu.memory_space<smem>>, %arg7: memref<2x128x128xf32, #tpu.memory_space<vmem>>, %arg8: memref<1x256xf32, #tpu.memory_space<vmem>>) attributes {dimension_semantics = [#tpu.dimension_semantics<parallel>], iteration_bounds = array<i64: 1>, scalar_prefetch = 0 : i64, scratch_operands = 0 : i64, tpu.core_type = #tpu.core_type<tc>, window_params = [{transform_indices = @transform_0, window_bounds = array<i64: 129, 256>}, {transform_indices = @transform_1, window_bounds = array<i64: 2, 128, 129>}, {pipeline_mode = #tpu.pipeline_mode<synchronous>, transform_indices = @transform_2, window_bounds = array<i64: 128, 128>}, {pipeline_mode = #tpu.pipeline_mode<synchronous>, transform_indices = @transform_3, window_bounds = array<i64: 64, 129>}, {pipeline_mode = #tpu.pipeline_mode<synchronous>, transform_indices = @transform_4, window_bounds = array<i64: 64, 1>}, {transform_indices = @transform_5, window_bounds = array<i64: 1>}, {transform_indices = @transform_6, window_bounds = array<i64: 2, 128, 128>}, {transform_indices = @transform_7, window_bounds = array<i64: 1, 256>}]} {
    %c0 = arith.constant 0 : index
    %c0_0 = arith.constant 0 : index
    %0 = vector.load %arg4[%c0, %c0_0] : memref<64x129xbf16, #tpu.memory_space<vmem>>, vector<64x129xbf16>
    %c0_1 = arith.constant 0 : index
    %c0_2 = arith.constant 0 : index
    %1 = vector.load %arg1[%c0_1, %c0_2] : memref<129x256xbf16, #tpu.memory_space<vmem>>, vector<129x256xbf16>
    %cst = arith.constant dense<0.000000e+00> : vector<64x256xf32>
    %2 = tpu.matmul %0, %1, %cst {dimension_numbers = #tpu.dot_dimension_numbers<[1], [0], [0], [1], [0, 0, 1, 1], [], []>} : vector<64x129xbf16>, vector<129x256xbf16>, vector<64x256xf32> -> vector<64x256xf32>
    %3 = math.tanh %2 : vector<64x256xf32>
    %c0_3 = arith.constant 0 : index
    %c0_4 = arith.constant 0 : index
    %4 = vector.load %arg5[%c0_3, %c0_4] : memref<64x1xf32, #tpu.memory_space<vmem>>, vector<64x1xf32>
    %5 = vector.broadcast %4 : vector<64x1xf32> to vector<64x256xf32>
    %6 = arith.mulf %3, %5 : vector<64x256xf32>
    %cst_5 = arith.constant dense<0.000000e+00> : vector<256xf32>
    %7 = vector.multi_reduction <add>, %6, %cst_5 [0] : vector<64x256xf32> to vector<256xf32>
    %8 = vector.shape_cast %7 : vector<256xf32> to vector<1x256xf32>
    %c0_6 = arith.constant 0 : index
    %9 = memref.load %arg6[%c0_6] : memref<1xf32, #tpu.memory_space<smem>>
    %10 = vector.broadcast %9 : f32 to vector<1x256xf32>
    %11 = arith.addf %8, %10 : vector<1x256xf32>
    %12 = arith.negf %11 : vector<1x256xf32>
    %13 = math.exp %12 : vector<1x256xf32>
    %cst_7 = arith.constant 1.000000e+00 : f32
    %14 = vector.broadcast %cst_7 : f32 to vector<1x256xf32>
    %15 = arith.addf %14, %13 : vector<1x256xf32>
    %16 = arith.divf %14, %15 : vector<1x256xf32>
    %c0_8 = arith.constant 0 : index
    %c0_9 = arith.constant 0 : index
    %17 = vector.load %arg8[%c0_8, %c0_9] : memref<1x256xf32, #tpu.memory_space<vmem>>, vector<1x256xf32>
    tpu.vector_store %arg8[%c0_8, %c0_9], %16 {strides = array<i32>} : memref<1x256xf32, #tpu.memory_space<vmem>>, vector<1x256xf32>,
    %c0_10 = arith.constant 0 : index
    %c0_11 = arith.constant 0 : index
    %18 = vector.load %arg3[%c0_10, %c0_11] : memref<128x128xbf16, #tpu.memory_space<vmem>>, vector<128x128xbf16>
    %19 = vector.extract_strided_slice %16 {offsets = [0, 0], sizes = [1, 128], strides = [1, 1]} : vector<1x256xf32> to vector<1x128xf32>
    %20 = arith.extf %18 : vector<128x128xbf16> to vector<128x128xf32>
    %21 = vector.broadcast %19 : vector<1x128xf32> to vector<128x128xf32>
    %22 = arith.mulf %20, %21 : vector<128x128xf32>
    %23 = arith.truncf %22 : vector<128x128xf32> to vector<128x128xbf16>
    %c0_12 = arith.constant 0 : index
    %c0_13 = arith.constant 0 : index
    %c0_14 = arith.constant 0 : index
    %24 = vector.load %arg2[%c0_12, %c0_13, %c0_14] : memref<2x128x129xbf16, #tpu.memory_space<vmem>>, vector<1x128x129xbf16>
    %25 = vector.shape_cast %24 : vector<1x128x129xbf16> to vector<128x129xbf16>
    %cst_15 = arith.constant dense<0.000000e+00> : vector<128x129xf32>
    %26 = tpu.matmul %23, %25, %cst_15 {dimension_numbers = #tpu.dot_dimension_numbers<[1], [0], [0], [1], [0, 0, 1, 1], [], []>} : vector<128x128xbf16>, vector<128x129xbf16>, vector<128x129xf32> -> vector<128x129xf32>
    %27 = vector.extract_strided_slice %26 {offsets = [0, 0], sizes = [128, 128], strides = [1, 1]} : vector<128x129xf32> to vector<128x128xf32>
    %28 = vector.extract_strided_slice %26 {offsets = [0, 128], sizes = [128, 1], strides = [1, 1]} : vector<128x129xf32> to vector<128x1xf32>
    %29 = tpu.reciprocal %28 : vector<128x1xf32> -> vector<128x1xf32>
    %30 = vector.broadcast %29 : vector<128x1xf32> to vector<128x128xf32>
    %31 = arith.mulf %27, %30 : vector<128x128xf32>
    %c0_16 = arith.constant 0 : index
    %c0_17 = arith.constant 0 : index
    %c0_18 = arith.constant 0 : index
    %32 = vector.load %arg7[%c0_16, %c0_17, %c0_18] : memref<2x128x128xf32, #tpu.memory_space<vmem>>, vector<1x128x128xf32>
    %33 = vector.shape_cast %32 : vector<1x128x128xf32> to vector<128x128xf32>
    %34 = vector.shape_cast %31 : vector<128x128xf32> to vector<1x128x128xf32>
    tpu.vector_store %arg7[%c0_16, %c0_17, %c0_18], %34 {strides = array<i32>} : memref<2x128x128xf32, #tpu.memory_space<vmem>>, vector<1x128x128xf32>,
    %35 = vector.extract_strided_slice %16 {offsets = [0, 128], sizes = [1, 128], strides = [1, 1]} : vector<1x256xf32> to vector<1x128xf32>
    %36 = arith.extf %18 : vector<128x128xbf16> to vector<128x128xf32>
    %37 = vector.broadcast %35 : vector<1x128xf32> to vector<128x128xf32>
    %38 = arith.mulf %36, %37 : vector<128x128xf32>
    %39 = arith.truncf %38 : vector<128x128xf32> to vector<128x128xbf16>
    %c1 = arith.constant 1 : index
    %c0_19 = arith.constant 0 : index
    %c0_20 = arith.constant 0 : index
    %40 = vector.load %arg2[%c1, %c0_19, %c0_20] : memref<2x128x129xbf16, #tpu.memory_space<vmem>>, vector<1x128x129xbf16>
    %41 = vector.shape_cast %40 : vector<1x128x129xbf16> to vector<128x129xbf16>
    %cst_21 = arith.constant dense<0.000000e+00> : vector<128x129xf32>
    %42 = tpu.matmul %39, %41, %cst_21 {dimension_numbers = #tpu.dot_dimension_numbers<[1], [0], [0], [1], [0, 0, 1, 1], [], []>} : vector<128x128xbf16>, vector<128x129xbf16>, vector<128x129xf32> -> vector<128x129xf32>
    %43 = vector.extract_strided_slice %42 {offsets = [0, 0], sizes = [128, 128], strides = [1, 1]} : vector<128x129xf32> to vector<128x128xf32>
    %44 = vector.extract_strided_slice %42 {offsets = [0, 128], sizes = [128, 1], strides = [1, 1]} : vector<128x129xf32> to vector<128x1xf32>
    %45 = tpu.reciprocal %44 : vector<128x1xf32> -> vector<128x1xf32>
    %46 = vector.broadcast %45 : vector<128x1xf32> to vector<128x128xf32>
    %47 = arith.mulf %43, %46 : vector<128x128xf32>
    %c1_22 = arith.constant 1 : index
    %c0_23 = arith.constant 0 : index
    %c0_24 = arith.constant 0 : index
    %48 = vector.load %arg7[%c1_22, %c0_23, %c0_24] : memref<2x128x128xf32, #tpu.memory_space<vmem>>, vector<1x128x128xf32>
    %49 = vector.shape_cast %48 : vector<1x128x128xf32> to vector<128x128xf32>
    %50 = vector.shape_cast %47 : vector<128x128xf32> to vector<1x128x128xf32>
    tpu.vector_store %arg7[%c1_22, %c0_23, %c0_24], %50 {strides = array<i32>} : memref<2x128x128xf32, #tpu.memory_space<vmem>>, vector<1x128x128xf32>,
    return
  }
  func.func @transform_0(%arg0: i32) -> (i32, i32) {
    %c0_i32 = arith.constant 0 : i32
    %c0_i32_0 = arith.constant 0 : i32
    return %c0_i32, %arg0 : i32, i32
  }
  func.func @transform_1(%arg0: i32) -> (i32, i32, i32) {
    %c0_i32 = arith.constant 0 : i32
    %c0_i32_0 = arith.constant 0 : i32
    %c0_i32_1 = arith.constant 0 : i32
    return %arg0, %c0_i32, %c0_i32_0 : i32, i32, i32
  }
  func.func @transform_2(%arg0: i32) -> (i32, i32) {
    %c0_i32 = arith.constant 0 : i32
    %c0_i32_0 = arith.constant 0 : i32
    %c0_i32_1 = arith.constant 0 : i32
    return %c0_i32, %c0_i32_0 : i32, i32
  }
  func.func @transform_3(%arg0: i32) -> (i32, i32) {
    %c0_i32 = arith.constant 0 : i32
    %c0_i32_0 = arith.constant 0 : i32
    %c0_i32_1 = arith.constant 0 : i32
    return %c0_i32, %c0_i32_0 : i32, i32
  }
  func.func @transform_4(%arg0: i32) -> (i32, i32) {
    %c0_i32 = arith.constant 0 : i32
    %c0_i32_0 = arith.constant 0 : i32
    %c0_i32_1 = arith.constant 0 : i32
    return %c0_i32, %c0_i32_0 : i32, i32
  }
  func.func @transform_5(%arg0: i32) -> i32 {
    %c0_i32 = arith.constant 0 : i32
    %c0_i32_0 = arith.constant 0 : i32
    return %c0_i32 : i32
  }
  func.func @transform_6(%arg0: i32) -> (i32, i32, i32) {
    %c0_i32 = arith.constant 0 : i32
    %c0_i32_0 = arith.constant 0 : i32
    %c0_i32_1 = arith.constant 0 : i32
    return %arg0, %c0_i32, %c0_i32_0 : i32, i32, i32
  }
  func.func @transform_7(%arg0: i32) -> (i32, i32) {
    %c0_i32 = arith.constant 0 : i32
    %c0_i32_0 = arith.constant 0 : i32
    return %c0_i32, %arg0 : i32, i32
  }
}

</mosaic_0001>

<bundles_post_ra>
// kernel: attention_ring_pallas.1
= control target key start
LH: loop header
LB: loop body
LE: loop exit
PB: predicated region body
PF: predicated region fallthrough
CT: control target
= control target key end

     0   :  { %v1544_v2 = vmov 0   ;;  %vm174_vm0 = vcmask 7168   ;;  %vm187_vm1 = vcmask 1040384   ;;  %s2034_s0 = inlined_call_operand.vmem [shape: bf16[129,256], index: 0, kind: input, shape index: {}]   ;;  %s2035_s1 = inlined_call_operand.vmem [shape: bf16[2,128,129], index: 1, kind: input, shape index: {}]   ;;  %s2036_s2 = inlined_call_operand.vmem [shape: bf16[128,128], index: 2, kind: input, shape index: {}]   ;;  %s2037_s3 = inlined_call_operand.vmem [shape: bf16[64,129], index: 3, kind: input, shape index: {}]   ;;  %s2038_s4 = inlined_call_operand.vmem [shape: f32[64,1], index: 4, kind: input, shape index: {}]   ;;  %s2039_s5 = inlined_call_operand.<no memory space> [shape: f32[1], index: 5, kind: input, shape index: {}]   ;;  %s2040_s6 = inlined_call_operand.hbm [shape: f32[2,128,128], index: 6, kind: output, shape index: {0}]   ;;  %s2041_s7 = inlined_call_operand.vmem [shape: f32[1,256], index: 7, kind: output, shape index: {1}]  }
   0x1   :  { %v1332_v0 = vld [vmem:[%s2034_s0 + $0x74] ss:$8 sps:$4 sm:$0xff]   ;;  %v1334_v1 = vld [vmem:[%s2034_s0 + $0x70] ss:$8 sps:$4 sm:$0xff]   ;;  %1330 = vset.pattern.permute.xlu0 %v1544_v2  ;;  %1331 = vset.pattern.permute.xlu1 %v1544_v2  ;;  %v1335_v3 = vld [vmem:[%s2034_s0 + $0x64] ss:$8 sps:$4 sm:$0xff]  }
   0x2   :  { %196 = vmatprep.subr.bf16.mxu0 %v1332_v0  ;;  %598 = vmatprep.mubr.bf16.mxu1 %v1544_v2  ;;  %v1337_v4 = vld [vmem:[%s2034_s0 + $0x60] ss:$8 sps:$4 sm:$0xff]   ;;  %v1338_v5 = vld [vmem:[%s2034_s0 + $0x54] ss:$8 sps:$4 sm:$0xff]   ;;  %v1340_v6 = vld [vmem:[%s2034_s0 + $0x50] ss:$8 sps:$4 sm:$0xff]  }
   0x3   :  { %197 = vmatpush1.bf16.msra.mxu0 %v1334_v1  ;;  %v1341_v7 = vld [vmem:[%s2034_s0 + $0x44] ss:$8 sps:$4 sm:$0xff]   ;;  %v1343_v8 = vld [vmem:[%s2034_s0 + $0x40] ss:$8 sps:$4 sm:$0xff]   ;;  %v1344_v9 = vld [vmem:[%s2034_s0 + $0x34] ss:$8 sps:$4 sm:$0xff]  }
   0x4   :  { %198 = vmatprep.subr.bf16.mxu0 %v1335_v3  ;;  %v1360_v10 = vld [vmem:[%s2037_s3 + $0x4] ss:$8 sps:$4 sm:$0xff]   ;;  %v1346_v11 = vld [vmem:[%s2034_s0 + $0x30] ss:$8 sps:$4 sm:$0xff]   ;;  %v1349_v15 = vld [vmem:[%s2034_s0 + $0x20] ss:$8 sps:$4 sm:$0xff]  }
   0x5   :  { %1216 = vmatprep.mubr.msk.bf16.mxu0 %vm174_vm0, %v1360_v10  ;;  %v1347_v12 = vld [vmem:[%s2034_s0 + $0x24] ss:$8 sps:$4 sm:$0xff]   ;;  %v287_v14 = vld [vmem:[%s2038_s4 + $0x10] sm:$0xff]  ;;  %v288_v18 = vld [vmem:[%s2038_s4 + $0x18] sm:$0xff]  ;;  %v189_v28 = vsel %vm187_vm1, 65535, %v1544_v2 }
   0x6   :  { %v285_v13 = vld [vmem:[%s2038_s4] sm:$0xff]  ;;  %305 = vperm.xlu1 %1331, %v287_v14   ;;  %v1350_v16 = vld [vmem:[%s2034_s0 + $0x14] ss:$8 sps:$4 sm:$0xff]   ;;  %v286_v17 = vld [vmem:[%s2038_s4 + $0x8] sm:$0xff] }
   0x7   :  { %199 = vmatpush1.bf16.msra.mxu0 %v1337_v4  ;;  %295 = vperm.xlu0 %1330, %v285_v13   ;;  %v52_v19 = vld [vmem:[%s2034_s0 + $0x80] sm:$0x11]  ;;  %v290_v21 = vld [vmem:[%s2038_s4 + $0x28] sm:$0xff]  ;;  %v1352_v22 = vld [vmem:[%s2034_s0 + $0x10] ss:$8 sps:$4 sm:$0xff]  }
   0x8   :  { %200 = vmatprep.subr.bf16.mxu0 %v1338_v5  ;;  %v289_v20 = vld [vmem:[%s2038_s4 + $0x20] sm:$0xff]  ;;  %v1215_v24 = vcombine.high %v52_v19, %v52_v19  ;;  %v291_v25 = vld [vmem:[%s2038_s4 + $0x30] sm:$0xff]  ;;  %v292_v26 = vld [vmem:[%s2038_s4 + $0x38] sm:$0xff]  ;;  %v1214_v29 = vcombine.low %v52_v19, %v52_v19 }
   0x9   :  { %v1353_v23 = vld [vmem:[%s2034_s0 + $0x4] ss:$8 sps:$4 sm:$0xff]   ;;  %v1355_v27 = vld [vmem:[%s2034_s0] ss:$8 sps:$4 sm:$0xff]  }
   0xa   :  { %310 = vperm.xlu1 %1331, %v288_v18   ;;  %v194_v30 = vand.u32 %v1215_v24, %v189_v28 }
   0xb   :  { %201 = vmatpush1.bf16.msra.mxu0 %v1340_v6  ;;  %300 = vperm.xlu0 %1330, %v286_v17  }
   0xc   :  { %202 = vmatprep.subr.bf16.mxu0 %v1341_v7 }
   0xe   :  { %320 = vperm.xlu1 %1331, %v290_v21  }
   0xf   :  { %203 = vmatpush1.bf16.msra.mxu0 %v1343_v8  ;;  %315 = vperm.xlu0 %1330, %v289_v20  }
  0x10   :  { %204 = vmatprep.subr.bf16.mxu0 %v1344_v9 }
  0x12   :  { %330 = vperm.xlu1 %1331, %v292_v26  }
  0x13   :  { %205 = vmatpush1.bf16.msra.mxu0 %v1346_v11  ;;  %325 = vperm.xlu0 %1330, %v291_v25  }
  0x14   :  { %206 = vmatprep.subr.bf16.mxu0 %v1347_v12 }
  0x17   :  { %207 = vmatpush1.bf16.msra.mxu0 %v1349_v15 }
  0x18   :  { %208 = vmatprep.subr.bf16.mxu0 %v1350_v16 }
  0x1b   :  { %209 = vmatpush1.bf16.msra.mxu0 %v1352_v22 }
  0x1c   :  { %210 = vmatprep.subr.bf16.mxu0 %v1353_v23 }
  0x1d   :  { %14 = vsyncpa [#allocation4], 0  ;;  %v191_v31 = vand.u32 %v1214_v29, %v189_v28  ;;  %v1358_v32 = vld [vmem:[%s2037_s3] ss:$8 sps:$4 sm:$0xff]   ;;  %v1361_v33 = vld [vmem:[%s2037_s3 + $0x14] ss:$8 sps:$4 sm:$0xff]  }
  0x1e   :  { %v1363_v34 = vld [vmem:[%s2037_s3 + $0x10] ss:$8 sps:$4 sm:$0xff]   ;;  %v1364_v35 = vld [vmem:[%s2037_s3 + $0x24] ss:$8 sps:$4 sm:$0xff]   ;;  %v1366_v36 = vld [vmem:[%s2037_s3 + $0x20] ss:$8 sps:$4 sm:$0xff]  }
  0x1f   :  { %211 = vmatpush1.bf16.msra.mxu0 %v1355_v27  ;;  %v1367_v37 = vld [vmem:[%s2037_s3 + $0x34] ss:$8 sps:$4 sm:$0xff]   ;;  %v1369_v38 = vld [vmem:[%s2037_s3 + $0x30] ss:$8 sps:$4 sm:$0xff]   ;;  %v1376_v43 = vld [vmem:[%s2035_s1 + $0x64] ss:$8 sps:$4 sm:$0xff]  }
  0x20   :  { %226 = vmatprep.subr.bf16.mxu0 %v194_v30  ;;  %v1370_v39 = vld [vmem:[%s2035_s1 + $0x74] ss:$8 sps:$4 sm:$0xff]   ;;  %v1372_v40 = vld [vmem:[%s2035_s1 + $0x70] ss:$8 sps:$4 sm:$0xff]   ;;  %v1378_v44 = vld [vmem:[%s2035_s1 + $0x60] ss:$8 sps:$4 sm:$0xff]  }
  0x21   :  { %566 = vmatprep.subr.bf16.mxu1 %v1370_v39  ;;  %v1375_v41 = vld [vmem:[%s2035_s1 + $0xf4] ss:$8 sps:$4 sm:$0xff]   ;;  %v1709_v42 = vld [vmem:[%s2035_s1 + $0xf0] ss:$8 sps:$4 sm:$0xff]   ;;  %v1721_v45 = vld [vmem:[%s2035_s1 + $0xe4] ss:$8 sps:$4 sm:$0xff]  }
  0x22   :  { %567 = vmatpush1.bf16.msra.mxu1 %v1372_v40  ;;  %v1726_v46 = vld [vmem:[%s2035_s1 + $0xe0] ss:$8 sps:$4 sm:$0xff]   ;;  %v1382_v47 = vld [vmem:[%s2035_s1 + $0x54] ss:$8 sps:$4 sm:$0xff]   ;;  %v1384_v48 = vld [vmem:[%s2035_s1 + $0x50] ss:$8 sps:$4 sm:$0xff]  }
  0x23   :  { %227 = vmatpush2.bf16.msra.mxu0 %v191_v31  ;;  %568 = vmatprep.subr.bf16.mxu1 %v1376_v43  ;;  %v1739_v49 = vld [vmem:[%s2035_s1 + $0xd4] ss:$8 sps:$4 sm:$0xff]   ;;  %v1744_v50 = vld [vmem:[%s2035_s1 + $0xd0] ss:$8 sps:$4 sm:$0xff]   ;;  %v1388_v51 = vld [vmem:[%s2035_s1 + $0x44] ss:$8 sps:$4 sm:$0xff]  }
  0x24   :  { %928 = vmatprep.subr.bf16.mxu0 %v1375_v41  ;;  %v1390_v52 = vld [vmem:[%s2035_s1 + $0x40] ss:$8 sps:$4 sm:$0xff]   ;;  %v1757_v53 = vld [vmem:[%s2035_s1 + $0xc4] ss:$8 sps:$4 sm:$0xff]   ;;  %v1394_v55 = vld [vmem:[%s2035_s1 + $0x34] ss:$8 sps:$4 sm:$0xff]  }
  0x25   :  { %v1762_v54 = vld [vmem:[%s2035_s1 + $0xc0] ss:$8 sps:$4 sm:$0xff]   ;;  %v1396_v56 = vld [vmem:[%s2035_s1 + $0x30] ss:$8 sps:$4 sm:$0xff]   ;;  %v1775_v57 = vld [vmem:[%s2035_s1 + $0xb4] ss:$8 sps:$4 sm:$0xff]  }
  0x26   :  { %229 = vmatmul.mubr.bf16.vlgmr.msra.gmra.mxu0 %v1358_v32  ;;  %569 = vmatpush1.bf16.msra.mxu1 %v1378_v44  ;;  %v1780_v58 = vld [vmem:[%s2035_s1 + $0xb0] ss:$8 sps:$4 sm:$0xff]   ;;  %v1400_v59 = vld [vmem:[%s2035_s1 + $0x24] ss:$8 sps:$4 sm:$0xff]   ;;  %v1402_v60 = vld [vmem:[%s2035_s1 + $0x20] ss:$8 sps:$4 sm:$0xff]  }
  0x27   :  { %1217 = vmatprep.mubr.msk.bf16.mxu0 %vm174_vm0, %v1361_v33  ;;  %929 = vmatpush1.bf16.msra.mxu0 %v1709_v42  ;;  %v1793_v61 = vld [vmem:[%s2035_s1 + $0xa4] ss:$8 sps:$4 sm:$0xff]   ;;  %v1798_v62 = vld [vmem:[%s2035_s1 + $0xa0] ss:$8 sps:$4 sm:$0xff]   ;;  %v1406_v63 = vld [vmem:[%s2035_s1 + $0x14] ss:$8 sps:$4 sm:$0xff]  }
  0x28   :  { %930 = vmatprep.subr.bf16.mxu0 %v1721_v45  ;;  %570 = vmatprep.subr.bf16.mxu1 %v1382_v47  ;;  %v1408_v0 = vld [vmem:[%s2035_s1 + $0x10] ss:$8 sps:$4 sm:$0xff]   ;;  %v1811_v1 = vld [vmem:[%s2035_s1 + $0x94] ss:$8 sps:$4 sm:$0xff]   ;;  %v1412_v4 = vld [vmem:[%s2035_s1 + $0x4] ss:$8 sps:$4 sm:$0xff]  }
  0x29   :  { %v1816_v3 = vld [vmem:[%s2035_s1 + $0x90] ss:$8 sps:$4 sm:$0xff]   ;;  %v1414_v5 = vld [vmem:[%s2035_s1] ss:$8 sps:$4 sm:$0xff]   ;;  %v1829_v6 = vld [vmem:[%s2035_s1 + $0x84] ss:$8 sps:$4 sm:$0xff]  }
  0x2a   :  { %571 = vmatpush1.bf16.msra.mxu1 %v1384_v48  ;;  %v1834_v7 = vld [vmem:[%s2035_s1 + $0x80] ss:$8 sps:$4 sm:$0xff]  }
  0x2b   :  { %931 = vmatpush1.bf16.msra.mxu0 %v1726_v46  ;;  %572 = vmatprep.subr.bf16.mxu1 %v1388_v51 }
  0x2c   :  { %932 = vmatprep.subr.bf16.mxu0 %v1739_v49 }
  0x2e   :  { %239 = vmatmul.mubr.bf16.gmra.mxu0 %v1363_v34  ;;  %573 = vmatpush1.bf16.msra.mxu1 %v1390_v52 }
  0x2f   :  { %1218 = vmatprep.mubr.msk.bf16.mxu0 %vm174_vm0, %v1364_v35  ;;  %933 = vmatpush1.bf16.msra.mxu0 %v1744_v50 }
  0x30   :  { %934 = vmatprep.subr.bf16.mxu0 %v1757_v53  ;;  %574 = vmatprep.subr.bf16.mxu1 %v1394_v55 }
  0x32   :  { %575 = vmatpush1.bf16.msra.mxu1 %v1396_v56 }
  0x33   :  { %935 = vmatpush1.bf16.msra.mxu0 %v1762_v54  ;;  %576 = vmatprep.subr.bf16.mxu1 %v1400_v59 }
  0x34   :  { %936 = vmatprep.subr.bf16.mxu0 %v1775_v57 }
  0x36   :  { %249 = vmatmul.mubr.bf16.gmra.mxu0 %v1366_v36  ;;  %577 = vmatpush1.bf16.msra.mxu1 %v1402_v60 }
  0x37   :  { %1219 = vmatprep.mubr.msk.bf16.mxu0 %vm174_vm0, %v1367_v37  ;;  %937 = vmatpush1.bf16.msra.mxu0 %v1780_v58 }
  0x38   :  { %938 = vmatprep.subr.bf16.mxu0 %v1793_v61  ;;  %578 = vmatprep.subr.bf16.mxu1 %v1406_v63 }
  0x3a   :  { %579 = vmatpush1.bf16.msra.mxu1 %v1408_v0 }
  0x3b   :  { %939 = vmatpush1.bf16.msra.mxu0 %v1798_v62  ;;  %580 = vmatprep.subr.bf16.mxu1 %v1412_v4 }
  0x3c   :  { %940 = vmatprep.subr.bf16.mxu0 %v1811_v1 }
  0x3e   :  { %259 = vmatmul.mubr.bf16.gmra.mxu0 %v1369_v38  ;;  %581 = vmatpush1.bf16.msra.mxu1 %v1414_v5 }
  0x3f   :  { %960 = vmatprep.mubr.bf16.mxu0 %v1544_v2  ;;  %941 = vmatpush1.bf16.msra.mxu0 %v1816_v3 }
  0x40   :  { %942 = vmatprep.subr.bf16.mxu0 %v1829_v6  ;;  %1309 = vmatprep.subr.bf16.mxu1 %v1375_v41 }
  0x43   :  { %943 = vmatpush1.bf16.msra.mxu0 %v1834_v7 }
  0x81   :  { %v306_v22 = vpop.permute.xlu1 %305 }
  0x82   :  { %v296_v18 = vpop.permute.xlu0 %295 }
  0x85   :  { %v311_v34 = vpop.permute.xlu1 %310 }
  0x86   :  { %v301_v26 = vpop.permute.xlu0 %300 }
  0x89   :  { %v321_v0 = vpop.permute.xlu1 %320 }
  0x8a   :  { %v316_v41 = vpop.permute.xlu0 %315 }
  0xe6   :  { %v230_v8 = vpop.f32.mrf.mxu0 }
  0xe7   :  { %1418 = vtanh.f32 %v230_v8 }
  0xe8   :  { %v232_v9 = vpop.f32.mrf.mxu0 }
  0xe9   :  { %1420 = vtanh.f32 %v232_v9 }
  0xea   :  { %v234_v10 = vpop.f32.mrf.mxu0 }
  0xeb   :  { %1422 = vtanh.f32 %v234_v10 }
  0xec   :  { %v236_v11 = vpop.f32.mrf.mxu0 }
  0xed   :  { %1424 = vtanh.f32 %v236_v11  ;;  %v326_v11 = vpop.permute.xlu0 %325 }
  0xee   :  { %v240_v12 = vpop.f32.mrf.mxu0 }
  0xef   :  { %1426 = vtanh.f32 %v240_v12 }
  0xf0   :  { %v242_v13 = vpop.f32.mrf.mxu0 }
  0xf1   :  { %1428 = vtanh.f32 %v242_v13 }
  0xf2   :  { %v244_v14 = vpop.f32.mrf.mxu0 }
  0xf3   :  { %1430 = vtanh.f32 %v244_v14 }
  0xf4   :  { %v246_v15 = vpop.f32.mrf.mxu0  ;;  %v1419_v21 = vpop.eup %1418 }
  0xf5   :  { %1432 = vtanh.f32 %v246_v15  ;;  %v333_v37 = vmul.f32 %v1419_v21, %v296_v18  ;;  %v331_v21 = vpop.permute.xlu1 %330 }
  0xf6   :  { %v250_v16 = vpop.f32.mrf.mxu0  ;;  %v1421_v24 = vpop.eup %1420 }
  0xf7   :  { %1434 = vtanh.f32 %v250_v16  ;;  %v334_v44 = vmul.f32 %v1421_v24, %v296_v18 }
  0xf8   :  { %v252_v17 = vpop.f32.mrf.mxu0  ;;  %v1423_v25 = vpop.eup %1422 }
  0xf9   :  { %1436 = vtanh.f32 %v252_v17  ;;  %v335_v32 = vmul.f32 %v1423_v25, %v301_v26 }
  0xfa   :  { %v254_v19 = vpop.f32.mrf.mxu0  ;;  %v1425_v28 = vpop.eup %1424 }
  0xfb   :  { %1438 = vtanh.f32 %v254_v19  ;;  %v336_v39 = vmul.f32 %v1425_v28, %v301_v26  ;;  %v349_v48 = vadd.f32 %v335_v32, %v333_v37 }
  0xfc   :  { %v256_v20 = vpop.f32.mrf.mxu0  ;;  %v1427_v29 = vpop.eup %1426 }
  0xfd   :  { %1440 = vtanh.f32 %v256_v20  ;;  %v337_v38 = vmul.f32 %v1427_v29, %v306_v22  ;;  %v362_v55 = vadd.f32 %v336_v39, %v334_v44  ;;  %v376_v39 = vstv %s2039_s5 }
  0xfe   :  { %v260_v23 = vpop.f32.mrf.mxu0  ;;  %v1429_v31 = vpop.eup %1428 }
  0xff   :  { %1442 = vtanh.f32 %v260_v23  ;;  %v338_v47 = vmul.f32 %v1429_v31, %v306_v22  ;;  %v350_v59 = vadd.f32 %v349_v48, %v337_v38 }
 0x100   :  { %v262_v27 = vpop.f32.mrf.mxu0  ;;  %v1431_v33 = vpop.eup %1430 }
 0x101   :  { %1444 = vtanh.f32 %v262_v27  ;;  %v339_v51 = vmul.f32 %v1431_v33, %v311_v34  ;;  %v363_v5 = vadd.f32 %v362_v55, %v338_v47 }
 0x102   :  { %v264_v30 = vpop.f32.mrf.mxu0  ;;  %v1433_v36 = vpop.eup %1432 }
 0x103   :  { %1446 = vtanh.f32 %v264_v30  ;;  %v340_v56 = vmul.f32 %v1433_v36, %v311_v34  ;;  %v351_v4 = vadd.f32 %v350_v59, %v339_v51 }
 0x104   :  { %v266_v35 = vpop.f32.mrf.mxu0  ;;  %v1435_v40 = vpop.eup %1434 }
 0x105   :  { %1448 = vtanh.f32 %v266_v35  ;;  %v341_v60 = vmul.f32 %v1435_v40, %v316_v41  ;;  %v364_v12 = vadd.f32 %v363_v5, %v340_v56 }
 0x106   :  { %v1437_v43 = vpop.eup %1436 }
 0x107   :  { %v342_v8 = vmul.f32 %v1437_v43, %v316_v41  ;;  %v352_v13 = vadd.f32 %v351_v4, %v341_v60  ;;  %v1545_v60 = vmov 1966171168   ;;  %v1271_v4 = vld [vmem:[%s2036_s2] sm:$0xff]  }
 0x108   :  { %v1439_v52 = vpop.eup %1438 }
 0x109   :  { %v343_v9 = vmul.f32 %v1439_v52, %v321_v0  ;;  %v365_v17 = vadd.f32 %v364_v12, %v342_v8 }
 0x10a   :  { %v1441_v63 = vpop.eup %1440 }
 0x10b   :  { %v344_v14 = vmul.f32 %v1441_v63, %v321_v0  ;;  %v353_v18 = vadd.f32 %v352_v13, %v343_v9  ;;  %v395_v63 = vunpack.c.l.s4 %v1545_v60  ;;  %v397_v0 = vlaneseq }
 0x10c   :  { %v1443_v10 = vpop.eup %1442  ;;  %v1272_v9 = vunpack.c.l.bf16 %v1271_v4 }
 0x10d   :  { %v345_v15 = vmul.f32 %v1443_v10, %v326_v11  ;;  %v366_v22 = vadd.f32 %v365_v17, %v344_v14  ;;  %v396_v5 = vunpack.c.0.s8 %v395_v63  ;;  %v398_v8 = vshrl.u32 %v397_v0, 7 }
 0x10e   :  { %v1445_v16 = vpop.eup %1444  ;;  %v1273_v10 = vunpack.c.h.bf16 %v1271_v4  ;;  %vm411_vm2 = vcmp.lt.s32.totalorder %v397_v0, 256 }
 0x10f   :  { %v346_v19 = vmul.f32 %v1445_v16, %v326_v11  ;;  %v354_v23 = vadd.f32 %v353_v18, %v345_v15  ;;  %v1302_v11 = vld [vmem:[%s2036_s2 + $0x8] sm:$0xff]   ;;  %v399_v13 = vsub.s32 %v396_v5, %v398_v8 }
 0x110   :  { %v1447_v20 = vpop.eup %1446  ;;  %v1276_v17 = vunpack.c.l.bf16 %v1302_v11  ;;  %v1277_v18 = vunpack.c.h.bf16 %v1302_v11 }
 0x111   :  { %v347_v24 = vmul.f32 %v1447_v20, %v331_v21  ;;  %v367_v26 = vadd.f32 %v366_v22, %v346_v19 }
 0x112   :  { %v1449_v25 = vpop.eup %1448 }
 0x113   :  { %v355_v27 = vadd.f32 %v354_v23, %v347_v24  ;;  %v348_v28 = vmul.f32 %v1449_v25, %v331_v21 }
 0x115   :  { %v356_v29 = vrot.slane %v355_v27, 4  ;;  %v368_v30 = vadd.f32 %v367_v26, %v348_v28  ;;  %v1303_v28 = vld [vmem:[%s2036_s2 + $0x10] sm:$0xff]  }
 0x117   :  { %v357_v31 = vadd.f32 %v356_v29, %v355_v27  ;;  %v369_v32 = vrot.slane %v368_v30, 4 }
 0x119   :  { %v358_v33 = vrot.slane %v357_v31, 2  ;;  %v370_v34 = vadd.f32 %v369_v32, %v368_v30  ;;  %v1280_v30 = vunpack.c.l.bf16 %v1303_v28 }
 0x11b   :  { %v359_v35 = vadd.f32 %v358_v33, %v357_v31  ;;  %v371_v36 = vrot.slane %v370_v34, 2  ;;  %v1281_v31 = vunpack.c.h.bf16 %v1303_v28 }
 0x11d   :  { %v360_v37 = vrot.slane %v359_v35, 1  ;;  %v372_v38 = vadd.f32 %v371_v36, %v370_v34 }
 0x11f   :  { %v361_v40 = vadd.f32 %v360_v37, %v359_v35  ;;  %v373_v41 = vrot.slane %v372_v38, 1 }
 0x121   :  { %v377_v43 = vadd.f32 %v376_v39, %v361_v40  ;;  %v374_v44 = vadd.f32 %v373_v41, %v372_v38 }
 0x123   :  { %v1220_v47 = vmul.f32 -1.442695, %v377_v43  ;;  %v378_v48 = vadd.f32 %v376_v39, %v374_v44 }
 0x125   :  { %1450 = vpow2.f32 %v1220_v47  ;;  %v1221_v51 = vmul.f32 -1.442695, %v378_v48 }
 0x127   :  { %1452 = vpow2.f32 %v1221_v51 }
 0x132   :  { %v1451_v52 = vpop.eup %1450 }
 0x133   :  { %v385_v55 = vadd.f32 1.0, %v1451_v52 }
 0x134   :  { %v1453_v56 = vpop.eup %1452 }
 0x135   :  { %1454 = vrcp.f32 %v385_v55  ;;  %v386_v59 = vadd.f32 1.0, %v1453_v56 }
 0x137   :  { %1456 = vrcp.f32 %v386_v59  ;;  %v1307_v59 = vld [vmem:[%s2036_s2 + $0x30] sm:$0xff]  }
 0x138   :  { %v1296_v0 = vunpack.c.l.bf16 %v1307_v59  ;;  %v1297_v4 = vunpack.c.h.bf16 %v1307_v59 }
 0x142   :  { %v1847_v12 = vpop.eup %1454 }
 0x143   :  { %v446_v14 = vmul.f32 %v1847_v12, %v1272_v9  ;;  %v447_v15 = vmul.f32 %v1847_v12, %v1273_v10  ;;  %v448_v26 = vmul.f32 %v1847_v12, %v1276_v17  ;;  %v449_v27 = vmul.f32 %v1847_v12, %v1277_v18 }
 0x144   :  { %v1851_v16 = vpop.eup %1456  ;;  %v450_v33 = vmul.f32 %v1847_v12, %v1280_v30  ;;  %v451_v34 = vmul.f32 %v1847_v12, %v1281_v31  ;;  %v458_v8 = vmul.f32 %v1847_v12, %v1296_v0 }
 0x145   :  { %v393_v19 = vcombine.low %v1847_v12, %v1851_v16  ;;  %v462_v20 = vpack.c.bf16 %v447_v15, %v446_v14  ;;  %v807_v21 = vmul.f32 %v1851_v16, %v1272_v9  ;;  %v808_v22 = vmul.f32 %v1851_v16, %v1273_v10  ;;  %v1308_v10 = vld [vmem:[%s2036_s2 + $0x38] sm:$0xff]  }
 0x146   :  { %v810_v29 = vmul.f32 %v1851_v16, %v1277_v18  ;;  %v812_v35 = vmul.f32 %v1851_v16, %v1281_v31  ;;  %v459_v9 = vmul.f32 %v1847_v12, %v1297_v4  ;;  %v1301_v14 = vunpack.c.h.bf16 %v1308_v10 }
 0x147   :  { %v400_v23 = vrot.slane %v393_v19, %v399_v13  ;;  %599 = vmatmul.mubr.bf16.vlgmr.msra.gmra.mxu1 %v462_v20  ;;  %v823_v24 = vpack.c.bf16 %v808_v22, %v807_v21  ;;  %v819_v19 = vmul.f32 %v1851_v16, %v1296_v0  ;;  %v820_v20 = vmul.f32 %v1851_v16, %v1297_v4 }
 0x148   :  { %1317 = vmatpush1.bf16.msra.mxu1 %v1709_v42  ;;  %608 = vmatprep.mubr.bf16.mxu1 %v1544_v2  ;;  %v809_v42 = vmul.f32 %v1851_v16, %v1276_v17  ;;  %v468_v11 = vpack.c.bf16 %v459_v9, %v458_v8  ;;  %v461_v17 = vmul.f32 %v1847_v12, %v1301_v14 }
 0x149   :  { %v407_v25 = vrot.slane %v400_v23, %v399_v13  ;;  %961 = vmatmul.mubr.bf16.vlgmr.msra.gmra.mxu0 %v823_v24  ;;  %1310 = vmatprep.subr.bf16.mxu1 %v1721_v45  ;;  %v463_v45 = vpack.c.bf16 %v449_v27, %v448_v26  ;;  %v1300_v13 = vunpack.c.l.bf16 %v1308_v10  ;;  %v829_v21 = vpack.c.bf16 %v820_v20, %v819_v19 }
 0x14a   :  { %970 = vmatprep.mubr.bf16.mxu0 %v1544_v2  ;;  %v824_v32 = vpack.c.bf16 %v810_v29, %v809_v42  ;;  %v822_v23 = vmul.f32 %v1851_v16, %v1301_v14 }
 0x14b   :  { %413 = vst.msk [vmem:[%s2041_s7] sm:$0x3] %vm411_vm2, %v407_v25  ;;  %v460_v15 = vmul.f32 %v1847_v12, %v1300_v13  ;;  %v821_v22 = vmul.f32 %v1851_v16, %v1300_v13 }
 0x14c   :  { %1318 = vmatpush1.bf16.msra.mxu1 %v1726_v46  ;;  %v1304_v46 = vld [vmem:[%s2036_s2 + $0x18] sm:$0xff]  }
 0x14d   :  { %1311 = vmatprep.subr.bf16.mxu1 %v1739_v49  ;;  %v811_v49 = vmul.f32 %v1851_v16, %v1280_v30  ;;  %v1284_v36 = vunpack.c.l.bf16 %v1304_v46  ;;  %v1285_v37 = vunpack.c.h.bf16 %v1304_v46  ;;  %v469_v18 = vpack.c.bf16 %v461_v17, %v460_v15 }
 0x14e   :  { %v830_v24 = vpack.c.bf16 %v822_v23, %v821_v22 }
 0x14f   :  { %609 = vmatmul.mubr.bf16.gmra.mxu1 %v463_v45  ;;  %v825_v38 = vpack.c.bf16 %v812_v35, %v811_v49  ;;  %v453_v39 = vmul.f32 %v1847_v12, %v1285_v37  ;;  %v814_v40 = vmul.f32 %v1851_v16, %v1285_v37 }
 0x150   :  { %618 = vmatprep.mubr.bf16.mxu1 %v1544_v2  ;;  %1319 = vmatpush1.bf16.msra.mxu1 %v1744_v50  ;;  %v464_v50 = vpack.c.bf16 %v451_v34, %v450_v33 }
 0x151   :  { %971 = vmatmul.mubr.bf16.gmra.mxu0 %v824_v32  ;;  %1312 = vmatprep.subr.bf16.mxu1 %v1757_v53  ;;  %v452_v53 = vmul.f32 %v1847_v12, %v1284_v36 }
 0x152   :  { %980 = vmatprep.mubr.bf16.mxu0 %v1544_v2 }
 0x154   :  { %1320 = vmatpush1.bf16.msra.mxu1 %v1762_v54  ;;  %v1305_v54 = vld [vmem:[%s2036_s2 + $0x20] sm:$0xff]  }
 0x155   :  { %1313 = vmatprep.subr.bf16.mxu1 %v1775_v57  ;;  %v813_v57 = vmul.f32 %v1851_v16, %v1284_v36  ;;  %v1288_v41 = vunpack.c.l.bf16 %v1305_v54  ;;  %v1289_v43 = vunpack.c.h.bf16 %v1305_v54 }
 0x157   :  { %619 = vmatmul.mubr.bf16.gmra.mxu1 %v464_v50  ;;  %v826_v44 = vpack.c.bf16 %v814_v40, %v813_v57  ;;  %v455_v47 = vmul.f32 %v1847_v12, %v1289_v43  ;;  %v816_v48 = vmul.f32 %v1851_v16, %v1289_v43 }
 0x158   :  { %628 = vmatprep.mubr.bf16.mxu1 %v1544_v2  ;;  %1321 = vmatpush1.bf16.msra.mxu1 %v1780_v58  ;;  %v465_v58 = vpack.c.bf16 %v453_v39, %v452_v53 }
 0x159   :  { %981 = vmatmul.mubr.bf16.gmra.mxu0 %v825_v38  ;;  %1314 = vmatprep.subr.bf16.mxu1 %v1793_v61  ;;  %v454_v61 = vmul.f32 %v1847_v12, %v1288_v41 }
 0x15a   :  { %990 = vmatprep.mubr.bf16.mxu0 %v1544_v2 }
 0x15c   :  { %1322 = vmatpush1.bf16.msra.mxu1 %v1798_v62  ;;  %v1306_v62 = vld [vmem:[%s2036_s2 + $0x28] sm:$0xff]   ;;  %s1546_s2 = smov [#allocation3]  }
 0x15d   :  { %1315 = vmatprep.subr.bf16.mxu1 %v1811_v1  ;;  %v815_v1 = vmul.f32 %v1851_v16, %v1288_v41  ;;  %v1292_v51 = vunpack.c.l.bf16 %v1306_v62  ;;  %v1293_v52 = vunpack.c.h.bf16 %v1306_v62  ;;  %s1175_s22 = sshll.u32 %s1546_s2, 4  ;;  %s1176_s22 = int_to_ptr.vmem [resolvable:$true] %s1175_s22 }
 0x15e   :  { %s1522_s23 = scalar_lea.vmem %s1176_s22, 4096  ;;  %p1527_p1 = scmp.lt.s32.totalorder %s1176_s22, %s1176_s22 }
 0x15f   :  { %629 = vmatmul.mubr.bf16.gmra.mxu1 %v465_v58  ;;  %v827_v55 = vpack.c.bf16 %v816_v48, %v815_v1  ;;  %v457_v56 = vmul.f32 %v1847_v12, %v1293_v52  ;;  %v818_v60 = vmul.f32 %v1851_v16, %v1293_v52  ;;  %p1523_p0 = scmp.ne.s32.totalorder %s1176_s22, %s1522_s23  ;;  %p1528_p2 = scmp.lt.s32.totalorder %s1522_s23, %s1522_s23 }
 0x160   :  { %638 = vmatprep.mubr.bf16.mxu1 %v1544_v2  ;;  %1323 = vmatpush1.bf16.msra.mxu1 %v1816_v3  ;;  %v466_v3 = vpack.c.bf16 %v455_v47, %v454_v61 }
 0x161   :  { %991 = vmatmul.mubr.bf16.gmra.mxu0 %v826_v44  ;;  %1316 = vmatprep.subr.bf16.mxu1 %v1829_v6  ;;  %v456_v6 = vmul.f32 %v1847_v12, %v1292_v51  ;;  %p1529_p3 = por %p1528_p2, %p1527_p1 }
 0x162   :  { %1000 = vmatprep.mubr.bf16.mxu0 %v1544_v2 }
 0x163   :  { %v467_v63 = vpack.c.bf16 %v457_v56, %v456_v6  ;;  %p1530_p4 = pnand %p1529_p3, %p1523_p0 }
 0x164   :  { %1324 = vmatpush1.bf16.msra.mxu1 %v1834_v7  ;;  %v817_v7 = vmul.f32 %v1851_v16, %v1292_v51 }
 0x166   :  { %v828_v5 = vpack.c.bf16 %v818_v60, %v817_v7 }
 0x167   :  { %639 = vmatmul.mubr.bf16.gmra.mxu1 %v466_v3 }
 0x168   :  { %648 = vmatprep.mubr.bf16.mxu1 %v1544_v2 }
 0x169   :  { %1001 = vmatmul.mubr.bf16.gmra.mxu0 %v827_v55 }
 0x16a   :  { %1010 = vmatprep.mubr.bf16.mxu0 %v1544_v2 }
 0x16f   :  { %649 = vmatmul.mubr.bf16.gmra.mxu1 %v467_v63 }
 0x170   :  { %658 = vmatprep.mubr.bf16.mxu1 %v1544_v2 }
 0x171   :  { %1011 = vmatmul.mubr.bf16.gmra.mxu0 %v828_v5 }
 0x177   :  { %659 = vmatmul.mubr.bf16.gmra.mxu1 %v468_v11 }
 0x178   :  { %668 = vmatprep.mubr.bf16.mxu1 %v1544_v2 }
 0x17f   :  { %669 = vmatmul.mubr.bf16.gmra.mxu1 %v469_v18 }
 0x180   :  { %1020 = vmatprep.mubr.bf16.mxu1 %v1544_v2 }
 0x187   :  { %1021 = vmatmul.mubr.bf16.vlgmr.msra.gmra.mxu1 %v829_v21 }
 0x188   :  { %1030 = vmatprep.mubr.bf16.mxu1 %v1544_v2 }
 0x18f   :  { %1031 = vmatmul.mubr.bf16.gmra.mxu1 %v830_v24 }
 0x207   :  { %v1935_v25 = vpop.f32.mrf.mxu1 }
 0x209   :  { %v602_v12 = vpop.f32.mrf.mxu1  ;;  %v1937_v26 = vpop.f32.mrf.mxu0 }
 0x20a   :  { %1458 = vrcp.f32 %v602_v12 }
 0x20b   :  { %v1939_v27 = vpop.f32.mrf.mxu1  ;;  %v964_v28 = vpop.f32.mrf.mxu0 }
 0x20c   :  { %1460 = vrcp.f32 %v964_v28 }
 0x20d   :  { %v606_v42 = vpop.f32.mrf.mxu1  ;;  %v1941_v29 = vpop.f32.mrf.mxu0 }
 0x20e   :  { %1462 = vrcp.f32 %v606_v42 }
 0x20f   :  { %v1943_v2 = vpop.f32.mrf.mxu1  ;;  %v968_v45 = vpop.f32.mrf.mxu0 }
 0x210   :  { %1464 = vrcp.f32 %v968_v45 }
 0x211   :  { %v612_v16 = vpop.f32.mrf.mxu1  ;;  %v1945_v30 = vpop.f32.mrf.mxu0 }
 0x212   :  { %1466 = vrcp.f32 %v612_v16 }
 0x213   :  { %v1947_v31 = vpop.f32.mrf.mxu1  ;;  %v974_v32 = vpop.f32.mrf.mxu0 }
 0x214   :  { %1468 = vrcp.f32 %v974_v32 }
 0x215   :  { %v616_v33 = vpop.f32.mrf.mxu1  ;;  %v1949_v34 = vpop.f32.mrf.mxu0 }
 0x216   :  { %1470 = vrcp.f32 %v616_v33 }
 0x217   :  { %v1459_v46 = vpop.eup %1458  ;;  %v1951_v49 = vpop.f32.mrf.mxu1 }
 0x218   :  { %v978_v35 = vpop.f32.mrf.mxu0  ;;  %697 = vperm.xlu0 %1330, %v1459_v46  }
 0x219   :  { %1472 = vrcp.f32 %v978_v35  ;;  %v622_v50 = vpop.f32.mrf.mxu1  ;;  %v1461_v37 = vpop.eup %1460 }
 0x21a   :  { %v1953_v36 = vpop.f32.mrf.mxu0  ;;  %1474 = vrcp.f32 %v622_v50 }
 0x21b   :  { %v1463_v38 = vpop.eup %1462  ;;  %v1955_v53 = vpop.f32.mrf.mxu1 }
 0x21c   :  { %v984_v39 = vpop.f32.mrf.mxu0  ;;  %702 = vperm.xlu1 %1331, %v1463_v38   ;;  %1059 = vperm.xlu0 %1330, %v1461_v37  }
 0x21d   :  { %1476 = vrcp.f32 %v984_v39  ;;  %v626_v54 = vpop.f32.mrf.mxu1  ;;  %v1465_v40 = vpop.eup %1464 }
 0x21e   :  { %v1957_v57 = vpop.f32.mrf.mxu0  ;;  %1478 = vrcp.f32 %v626_v54 }
 0x21f   :  { %v1467_v58 = vpop.eup %1466  ;;  %v1959_v41 = vpop.f32.mrf.mxu1 }
 0x220   :  { %v988_v43 = vpop.f32.mrf.mxu0  ;;  %707 = vperm.xlu0 %1330, %v1467_v58   ;;  %1064 = vperm.xlu1 %1331, %v1465_v40  }
 0x221   :  { %1480 = vrcp.f32 %v988_v43  ;;  %v632_v44 = vpop.f32.mrf.mxu1  ;;  %v1469_v47 = vpop.eup %1468 }
 0x222   :  { %v1961_v61 = vpop.f32.mrf.mxu0  ;;  %1482 = vrcp.f32 %v632_v44 }
 0x223   :  { %v1471_v62 = vpop.eup %1470  ;;  %v1963_v1 = vpop.f32.mrf.mxu1 }
 0x224   :  { %v994_v48 = vpop.f32.mrf.mxu0  ;;  %712 = vperm.xlu1 %1331, %v1471_v62   ;;  %1069 = vperm.xlu0 %1330, %v1469_v47  }
 0x225   :  { %1484 = vrcp.f32 %v994_v48  ;;  %v636_v3 = vpop.f32.mrf.mxu1 }
 0x226   :  { %v1965_v51 = vpop.f32.mrf.mxu0  ;;  %v1473_v52 = vpop.eup %1472  ;;  %1486 = vrcp.f32 %v636_v3 }
 0x227   :  { %v1475_v55 = vpop.eup %1474  ;;  %v1967_v6 = vpop.f32.mrf.mxu1 }
 0x228   :  { %v998_v56 = vpop.f32.mrf.mxu0  ;;  %717 = vperm.xlu0 %1330, %v1475_v55   ;;  %1074 = vperm.xlu1 %1331, %v1473_v52  }
 0x229   :  { %1488 = vrcp.f32 %v998_v56  ;;  %v642_v59 = vpop.f32.mrf.mxu1 }
 0x22a   :  { %v1969_v7 = vpop.f32.mrf.mxu0  ;;  %v1477_v60 = vpop.eup %1476  ;;  %1490 = vrcp.f32 %v642_v59 }
 0x22b   :  { %v1479_v63 = vpop.eup %1478  ;;  %v1971_v0 = vpop.f32.mrf.mxu1 }
 0x22c   :  { %v1004_v4 = vpop.f32.mrf.mxu0  ;;  %722 = vperm.xlu1 %1331, %v1479_v63   ;;  %1079 = vperm.xlu0 %1330, %v1477_v60  }
 0x22d   :  { %1492 = vrcp.f32 %v1004_v4  ;;  %v646_v5 = vpop.f32.mrf.mxu1 }
 0x22e   :  { %v1973_v8 = vpop.f32.mrf.mxu0  ;;  %v1481_v9 = vpop.eup %1480  ;;  %1494 = vrcp.f32 %v646_v5 }
 0x22f   :  { %v1483_v10 = vpop.eup %1482  ;;  %v1975_v11 = vpop.f32.mrf.mxu1 }
 0x230   :  { %v1008_v13 = vpop.f32.mrf.mxu0  ;;  %727 = vperm.xlu0 %1330, %v1483_v10   ;;  %1084 = vperm.xlu1 %1331, %v1481_v9  }
 0x231   :  { %1496 = vrcp.f32 %v1008_v13  ;;  %v652_v14 = vpop.f32.mrf.mxu1 }
 0x232   :  { %v1977_v15 = vpop.f32.mrf.mxu0  ;;  %v1485_v17 = vpop.eup %1484  ;;  %1498 = vrcp.f32 %v652_v14 }
 0x233   :  { %v1487_v18 = vpop.eup %1486  ;;  %v1979_v19 = vpop.f32.mrf.mxu1 }
 0x234   :  { %v1014_v20 = vpop.f32.mrf.mxu0  ;;  %732 = vperm.xlu1 %1331, %v1487_v18   ;;  %1089 = vperm.xlu0 %1330, %v1485_v17  }
 0x235   :  { %1500 = vrcp.f32 %v1014_v20  ;;  %v656_v21 = vpop.f32.mrf.mxu1 }
 0x236   :  { %v1981_v22 = vpop.f32.mrf.mxu0  ;;  %v1489_v23 = vpop.eup %1488  ;;  %1502 = vrcp.f32 %v656_v21 }
 0x237   :  { %v1491_v24 = vpop.eup %1490  ;;  %v1983_v12 = vpop.f32.mrf.mxu1 }
 0x238   :  { %v1018_v28 = vpop.f32.mrf.mxu0  ;;  %737 = vperm.xlu0 %1330, %v1491_v24   ;;  %1094 = vperm.xlu1 %1331, %v1489_v23  }
 0x239   :  { %1504 = vrcp.f32 %v1018_v28  ;;  %v662_v42 = vpop.f32.mrf.mxu1 }
 0x23a   :  { %v1493_v45 = vpop.eup %1492  ;;  %1506 = vrcp.f32 %v662_v42 }
 0x23b   :  { %v1495_v16 = vpop.eup %1494  ;;  %v1985_v32 = vpop.f32.mrf.mxu1 }
 0x23c   :  { %742 = vperm.xlu1 %1331, %v1495_v16   ;;  %1099 = vperm.xlu0 %1330, %v1493_v45  }
 0x23d   :  { %v666_v33 = vpop.f32.mrf.mxu1 }
 0x23e   :  { %v1497_v46 = vpop.eup %1496  ;;  %1508 = vrcp.f32 %v666_v33 }
 0x23f   :  { %v1499_v35 = vpop.eup %1498  ;;  %v1987_v50 = vpop.f32.mrf.mxu1 }
 0x240   :  { %747 = vperm.xlu0 %1330, %v1499_v35   ;;  %1104 = vperm.xlu1 %1331, %v1497_v46  }
 0x241   :  { %v672_v37 = vpop.f32.mrf.mxu1 }
 0x242   :  { %v1501_v38 = vpop.eup %1500  ;;  %1510 = vrcp.f32 %v672_v37 }
 0x243   :  { %v1503_v39 = vpop.eup %1502  ;;  %v1989_v54 = vpop.f32.mrf.mxu1 }
 0x244   :  { %752 = vperm.xlu1 %1331, %v1503_v39   ;;  %1109 = vperm.xlu0 %1330, %v1501_v38  }
 0x245   :  { %v676_v40 = vpop.f32.mrf.mxu1 }
 0x246   :  { %v1505_v58 = vpop.eup %1504  ;;  %1512 = vrcp.f32 %v676_v40 }
 0x247   :  { %v1507_v43 = vpop.eup %1506  ;;  %v1991_v44 = vpop.f32.mrf.mxu1 }
 0x248   :  { %757 = vperm.xlu0 %1330, %v1507_v43   ;;  %1114 = vperm.xlu1 %1331, %v1505_v58  }
 0x249   :  { %v1024_v47 = vpop.f32.mrf.mxu1 }
 0x24a   :  { %1514 = vrcp.f32 %v1024_v47 }
 0x24b   :  { %v1509_v62 = vpop.eup %1508  ;;  %v1993_v48 = vpop.f32.mrf.mxu1 }
 0x24c   :  { %762 = vperm.xlu1 %1331, %v1509_v62  }
 0x24d   :  { %v1028_v3 = vpop.f32.mrf.mxu1 }
 0x24e   :  { %1516 = vrcp.f32 %v1028_v3 }
 0x24f   :  { %v1511_v52 = vpop.eup %1510  ;;  %v1995_v55 = vpop.f32.mrf.mxu1 }
 0x250   :  { %767 = vperm.xlu0 %1330, %v1511_v52  }
 0x251   :  { %v1034_v56 = vpop.f32.mrf.mxu1 }
 0x252   :  { %1518 = vrcp.f32 %v1034_v56 }
 0x253   :  { %v1513_v59 = vpop.eup %1512  ;;  %v1997_v60 = vpop.f32.mrf.mxu1 }
 0x254   :  { %772 = vperm.xlu1 %1331, %v1513_v59  }
 0x255   :  { %v1038_v63 = vpop.f32.mrf.mxu1 }
 0x256   :  { %1520 = vrcp.f32 %v1038_v63 }
 0x257   :  { %v1515_v4 = vpop.eup %1514 }
 0x258   :  { %1119 = vperm.xlu0 %1330, %v1515_v4  }
 0x25b   :  { %v1517_v5 = vpop.eup %1516 }
 0x25c   :  { %1124 = vperm.xlu1 %1331, %v1517_v5  }
 0x25f   :  { %v1519_v9 = vpop.eup %1518 }
 0x260   :  { %1129 = vperm.xlu0 %1330, %v1519_v9  }
 0x263   :  { %v1521_v10 = vpop.eup %1520 }
 0x264   :  { %1134 = vperm.xlu1 %1331, %v1521_v10  }
 0x293   :  { %v698_v13 = vpop.permute.xlu0 %697 }
 0x294   :  { %v775_v14 = vmul.f32 %v698_v13, %v1935_v25 }
 0x296   :  { %791 = vst [vmem:[#allocation3] sm:$0xff] %v775_v14 }
 0x297   :  { %v703_v17 = vpop.permute.xlu1 %702  ;;  %v1060_v18 = vpop.permute.xlu0 %1059 }
 0x298   :  { %v776_v20 = vmul.f32 %v703_v17, %v1939_v27  ;;  %v1137_v21 = vmul.f32 %v1060_v18, %v1937_v26 }
 0x29a   :  { %792 = vst [vmem:[#allocation3 + $0x8] sm:$0xff] %v776_v20  ;;  %1154 = vst [vmem:[#allocation3 + $0x80] sm:$0xff] %v1137_v21 }
 0x29b   :  { %v708_v23 = vpop.permute.xlu0 %707  ;;  %v1065_v24 = vpop.permute.xlu1 %1064 }
 0x29c   :  { %v777_v28 = vmul.f32 %v708_v23, %v1943_v2  ;;  %v1138_v42 = vmul.f32 %v1065_v24, %v1941_v29 }
 0x29e   :  { %793 = vst [vmem:[#allocation3 + $0x10] sm:$0xff] %v777_v28  ;;  %1155 = vst [vmem:[#allocation3 + $0x88] sm:$0xff] %v1138_v42 }
 0x29f   :  { %v713_v45 = vpop.permute.xlu1 %712  ;;  %v1070_v16 = vpop.permute.xlu0 %1069 }
 0x2a0   :  { %v778_v25 = vmul.f32 %v713_v45, %v1947_v31  ;;  %v1139_v33 = vmul.f32 %v1070_v16, %v1945_v30 }
 0x2a2   :  { %794 = vst [vmem:[#allocation3 + $0x18] sm:$0xff] %v778_v25  ;;  %1156 = vst [vmem:[#allocation3 + $0x90] sm:$0xff] %v1139_v33 }
 0x2a3   :  { %v718_v27 = vpop.permute.xlu0 %717  ;;  %v1075_v26 = vpop.permute.xlu1 %1074 }
 0x2a4   :  { %v779_v46 = vmul.f32 %v718_v27, %v1951_v49  ;;  %v1140_v35 = vmul.f32 %v1075_v26, %v1949_v34 }
 0x2a6   :  { %795 = vst [vmem:[#allocation3 + $0x20] sm:$0xff] %v779_v46  ;;  %1157 = vst [vmem:[#allocation3 + $0x98] sm:$0xff] %v1140_v35 }
 0x2a7   :  { %v723_v2 = vpop.permute.xlu1 %722  ;;  %v1080_v29 = vpop.permute.xlu0 %1079 }
 0x2a8   :  { %v780_v37 = vmul.f32 %v723_v2, %v1955_v53  ;;  %v1141_v38 = vmul.f32 %v1080_v29, %v1953_v36 }
 0x2aa   :  { %796 = vst [vmem:[#allocation3 + $0x28] sm:$0xff] %v780_v37  ;;  %1158 = vst [vmem:[#allocation3 + $0xa0] sm:$0xff] %v1141_v38 }
 0x2ab   :  { %v728_v31 = vpop.permute.xlu0 %727  ;;  %v1085_v30 = vpop.permute.xlu1 %1084 }
 0x2ac   :  { %v781_v39 = vmul.f32 %v728_v31, %v1959_v41  ;;  %v1142_v40 = vmul.f32 %v1085_v30, %v1957_v57 }
 0x2ae   :  { %797 = vst [vmem:[#allocation3 + $0x30] sm:$0xff] %v781_v39  ;;  %1159 = vst [vmem:[#allocation3 + $0xa8] sm:$0xff] %v1142_v40 }
 0x2af   :  { %v733_v49 = vpop.permute.xlu1 %732  ;;  %v1090_v34 = vpop.permute.xlu0 %1089 }
 0x2b0   :  { %v782_v58 = vmul.f32 %v733_v49, %v1963_v1  ;;  %v1143_v43 = vmul.f32 %v1090_v34, %v1961_v61 }
 0x2b2   :  { %798 = vst [vmem:[#allocation3 + $0x38] sm:$0xff] %v782_v58  ;;  %1160 = vst [vmem:[#allocation3 + $0xb0] sm:$0xff] %v1143_v43 }
 0x2b3   :  { %v738_v53 = vpop.permute.xlu0 %737  ;;  %v1095_v36 = vpop.permute.xlu1 %1094 }
 0x2b4   :  { %v783_v47 = vmul.f32 %v738_v53, %v1967_v6  ;;  %v1144_v62 = vmul.f32 %v1095_v36, %v1965_v51 }
 0x2b6   :  { %799 = vst [vmem:[#allocation3 + $0x40] sm:$0xff] %v783_v47  ;;  %1161 = vst [vmem:[#allocation3 + $0xb8] sm:$0xff] %v1144_v62 }
 0x2b7   :  { %v743_v41 = vpop.permute.xlu1 %742  ;;  %v1100_v57 = vpop.permute.xlu0 %1099 }
 0x2b8   :  { %v784_v3 = vmul.f32 %v743_v41, %v1971_v0  ;;  %v1145_v52 = vmul.f32 %v1100_v57, %v1969_v7 }
 0x2ba   :  { %800 = vst [vmem:[#allocation3 + $0x48] sm:$0xff] %v784_v3  ;;  %1162 = vst [vmem:[#allocation3 + $0xc0] sm:$0xff] %v1145_v52 }
 0x2bb   :  { %v748_v1 = vpop.permute.xlu0 %747  ;;  %v1105_v61 = vpop.permute.xlu1 %1104 }
 0x2bc   :  { %v785_v56 = vmul.f32 %v748_v1, %v1975_v11  ;;  %v1146_v59 = vmul.f32 %v1105_v61, %v1973_v8 }
 0x2be   :  { %801 = vst [vmem:[#allocation3 + $0x50] sm:$0xff] %v785_v56  ;;  %1163 = vst [vmem:[#allocation3 + $0xc8] sm:$0xff] %v1146_v59 }
 0x2bf   :  { %v753_v6 = vpop.permute.xlu1 %752  ;;  %v1110_v51 = vpop.permute.xlu0 %1109 }
 0x2c0   :  { %v786_v63 = vmul.f32 %v753_v6, %v1979_v19  ;;  %v1147_v4 = vmul.f32 %v1110_v51, %v1977_v15 }
 0x2c2   :  { %802 = vst [vmem:[#allocation3 + $0x58] sm:$0xff] %v786_v63  ;;  %1164 = vst [vmem:[#allocation3 + $0xd0] sm:$0xff] %v1147_v4 }
 0x2c3   :  { %v758_v0 = vpop.permute.xlu0 %757  ;;  %v1115_v7 = vpop.permute.xlu1 %1114 }
 0x2c4   :  { %v787_v5 = vmul.f32 %v758_v0, %v1983_v12  ;;  %v1148_v9 = vmul.f32 %v1115_v7, %v1981_v22 }
 0x2c6   :  { %803 = vst [vmem:[#allocation3 + $0x60] sm:$0xff] %v787_v5  ;;  %1165 = vst [vmem:[#allocation3 + $0xd8] sm:$0xff] %v1148_v9 }
 0x2c7   :  { %v763_v11 = vpop.permute.xlu1 %762 }
 0x2c8   :  { %v788_v8 = vmul.f32 %v763_v11, %v1985_v32 }
 0x2ca   :  { %804 = vst [vmem:[#allocation3 + $0x68] sm:$0xff] %v788_v8 }
 0x2cb   :  { %v768_v10 = vpop.permute.xlu0 %767 }
 0x2cc   :  { %v789_v13 = vmul.f32 %v768_v10, %v1987_v50 }
 0x2ce   :  { %805 = vst [vmem:[#allocation3 + $0x70] sm:$0xff] %v789_v13 }
 0x2cf   :  { %v773_v19 = vpop.permute.xlu1 %772 }
 0x2d0   :  { %v790_v15 = vmul.f32 %v773_v19, %v1989_v54 }
 0x2d2   :  { %806 = vst [vmem:[#allocation3 + $0x78] sm:$0xff] %v790_v15 }
 0x2d3   :  { %v1120_v14 = vpop.permute.xlu0 %1119 }
 0x2d4   :  { %v1149_v17 = vmul.f32 %v1120_v14, %v1991_v44 }
 0x2d6   :  { %1166 = vst [vmem:[#allocation3 + $0xe0] sm:$0xff] %v1149_v17 }
 0x2d7   :  { %v1125_v12 = vpop.permute.xlu1 %1124 }
 0x2d8   :  { %v1150_v22 = vmul.f32 %v1125_v12, %v1993_v48 }
 0x2da   :  { %1167 = vst [vmem:[#allocation3 + $0xe8] sm:$0xff] %v1150_v22 }
 0x2db   :  { %v1130_v18 = vpop.permute.xlu0 %1129 }
 0x2dc   :  { %v1151_v32 = vmul.f32 %v1130_v18, %v1995_v55 }
 0x2de   :  { %1168 = vst [vmem:[#allocation3 + $0xf0] sm:$0xff] %v1151_v32 }
 0x2df   :  { %v1135_v50 = vpop.permute.xlu1 %1134 }
 0x2e0   :  { %v1152_v20 = vmul.f32 %v1135_v50, %v1997_v60 }
 0x2e2   :  { %1169 = vst [vmem:[#allocation3 + $0xf8] sm:$0xff] %v1152_v20 }
 0x2e3   :  { %1533 = shalt.err (!%p1530_p4)
}
 0x2e4   :  { %s1547_s24 = smov 128   ;;  %s1548_s25 = smov 8  }
 0x2e5   :  { %1181 = dma.vmem_to_hbm [thread:$0]  %s1176_s22, 4096, %s2040_s6, [#allocation4], %s1547_s24, %s1547_s24, %s1548_s25  }
 0x2e6   :  { %1542 = dma.done.wait [#allocation4], 4096  }
 0x2e7   :  { %1543 = vsyncadd [#allocation4], 4294963200 }
 0x2e8   :  { %1189 = vsyncpa [#allocation4], 1 }

</bundles_post_ra>
